<compile_context>
chip_gen: v7x
topology: tpu7x:2x2x1
jax: 0.10.0
libtpu: 0.0.40
codegen_flags: <defaults>
</compile_context>

<pallas_src>
import functools

import jax
import jax.numpy as jnp
from jax import lax
from jax.experimental import pallas as pl
from jax.experimental.pallas import tpu as pltpu


def _round_up(a, b):
    return (a + b - 1) // b * b


def sage_layer_kernel(mask_ref, invd_ref, h_ref, ws_ref, wn_ref, b_ref, o_ref,
                      *, tm, l2_normalize):
    """One SAGEConv('mean') layer + ReLU (+ optional row L2 normalize).

    grid = (row tiles,).  Per destination-row tile t:
      agg = (mask[t] @ H) * inv_degree[t]            # exact mean aggregation
      out = relu(H[t] @ W_self + agg @ W_neigh + b)  # f32 accumulate / epilogue
      out = out * rsqrt(max(||out||^2, eps^2))       # only for the last layer
    """
    t = pl.program_id(0)
    row0 = pl.multiple_of(t * tm, tm)

    # Mean aggregation: 0/1 mask (exact in bf16) on the MXU; the 1/in_degree
    # scale is applied in f32 after the matmul (no rounding of mean weights).
    agg = jnp.dot(mask_ref[...], h_ref[...], preferred_element_type=jnp.float32)
    agg = agg * invd_ref[...]                                   # (tm, F_in) f32

    h_self = h_ref[pl.ds(row0, tm), :]                          # (tm, F_in) bf16
    out = jnp.dot(h_self, ws_ref[...], preferred_element_type=jnp.float32)
    out += jnp.dot(agg.astype(jnp.bfloat16), wn_ref[...],
                   preferred_element_type=jnp.float32)
    out = jnp.maximum(out + b_ref[...], 0.0)                    # bias + ReLU (f32)

    if l2_normalize:
        # F.normalize(h, dim=1): h / max(||h||, 1e-12)
        #                      = h * rsqrt(max(||h||^2, 1e-24))   (single EUP op)
        sumsq = jnp.sum(out * out, axis=1, keepdims=True)
        out = out * lax.rsqrt(jnp.maximum(sumsq, 1e-24))

    o_ref[...] = out.astype(o_ref.dtype)


def _sage_layer(mask_p, invd_p, h_p, w_self, w_neigh, bias, *, tm, l2_normalize):
    """pallas_call wrapper for one SAGE layer.  All operands pre-padded."""
    n_pad, f_in_pad = h_p.shape
    f_out_pad = w_self.shape[1]
    num_tiles = n_pad // tm

    # Constant-index inputs never change across the grid -> single-buffer them.
    resident = functools.partial(pl.BlockSpec, pipeline_mode=pl.Buffered(1))

    vmem_bytes = (
        2 * tm * n_pad * 2                   # A mask tile (bf16, double-buffered)
        + 2 * tm * 128 * 4                   # 1/in_degree tile (f32, lane-padded)
        + n_pad * f_in_pad * 2               # resident H (bf16, single-buffered)
        + 2 * f_in_pad * f_out_pad * 2       # W_self + W_neigh (bf16)
        + 8 * f_out_pad * 4                  # bias (f32, sublane-padded)
        + 2 * tm * f_out_pad * 2             # output tile (bf16, double-buffered)
    )
    # Conservative cap for v7x's 64 MiB VMEM; raise toward ~100 MiB on v5e/v6e
    # for very large graphs if profiling shows spills.
    vmem_limit = int(min(max(2 * vmem_bytes, 16 * 1024 * 1024),
                         64 * 1024 * 1024))

    return pl.pallas_call(
        functools.partial(sage_layer_kernel, tm=tm, l2_normalize=l2_normalize),
        out_shape=jax.ShapeDtypeStruct((n_pad, f_out_pad), jnp.bfloat16),
        grid=(num_tiles,),
        in_specs=[
            pl.BlockSpec((tm, n_pad), lambda t: (t, 0)),        # adjacency mask rows
            pl.BlockSpec((tm, 1), lambda t: (t, 0)),            # 1/in_degree rows
            resident((n_pad, f_in_pad), lambda t: (0, 0)),      # full H (resident)
            resident((f_in_pad, f_out_pad), lambda t: (0, 0)),  # W_self
            resident((f_in_pad, f_out_pad), lambda t: (0, 0)),  # W_neigh
            resident((1, f_out_pad), lambda t: (0, 0)),         # bias
        ],
        out_specs=pl.BlockSpec((tm, f_out_pad), lambda t: (t, 0)),
        compiler_params=pltpu.CompilerParams(
            dimension_semantics=("parallel",),      # row tiles are independent
            vmem_limit_bytes=vmem_limit,
        ),
    )(mask_p, invd_p, h_p, w_self, w_neigh, bias)


def prepare_graph(adj):
    """One-time (per graph) preprocessing, kept OUT of the jitted forward path.

    Rows of `adj` are destination nodes; 'mean' aggregates over in-neighbours.
    Returns a zero-padded 0/1 bf16 mask, an exact f32 1/in_degree column, the
    chosen row tile tm, and the padded node count.
    """
    n = int(adj.shape[0])
    tm = 256 if n >= 256 else _round_up(max(n, 8), 8)
    n_pad = _round_up(n, tm)
    # Shrink the row tile so the double-buffered bf16 A tile leaves headroom in
    # v7x's 64 MiB VMEM next to the resident H / weight blocks.
    while tm > 128 and 2 * tm * n_pad * 2 > 24 * 1024 * 1024:
        tm //= 2
        n_pad = _round_up(n, tm)

    mask = (adj > 0).astype(jnp.float32)
    mask_p = jnp.zeros((n_pad, n_pad), jnp.bfloat16).at[:n, :n].set(
        mask.astype(jnp.bfloat16))                    # 0/1 values: exact in bf16
    inv_deg = 1.0 / jnp.maximum(jnp.sum(mask, axis=1, keepdims=True), 1.0)
    inv_deg_p = jnp.zeros((n_pad, 1), jnp.float32).at[:n, :].set(inv_deg)
    return mask_p, inv_deg_p, tm, n_pad


def graphsage_forward(mask_p, inv_deg_p, x, params, *, n, tm):
    """conv1 -> ReLU -> conv2 -> ReLU -> L2-normalize (rows)."""
    n_pad = mask_p.shape[0]
    in_feats = x.shape[1]
    hidden = params["w_self1"].shape[1]
    h_feats = params["w_self2"].shape[1]

    f_in_pad = _round_up(in_feats, 128)
    hid_pad = _round_up(hidden, 128)
    h_out_pad = _round_up(h_feats, 128)

    # Node features: bf16 MXU operand, zero-padded to a lane-dense shape.
    x_p = jnp.zeros((n_pad, f_in_pad), jnp.bfloat16).at[:n, :in_feats].set(
        x.astype(jnp.bfloat16))

    def pad_w(w, r, c):
        return jnp.zeros((r, c), jnp.bfloat16).at[:w.shape[0], :w.shape[1]].set(
            w.astype(jnp.bfloat16))

    def pad_b(b, c):
        b = b.reshape(1, -1).astype(jnp.float32)
        return jnp.zeros((1, c), jnp.float32).at[:, :b.shape[1]].set(b)

    w_self1 = pad_w(params["w_self1"], f_in_pad, hid_pad)
    w_neigh1 = pad_w(params["w_neigh1"], f_in_pad, hid_pad)
    b1 = pad_b(params["b1"], hid_pad)
    w_self2 = pad_w(params["w_self2"], hid_pad, h_out_pad)
    w_neigh2 = pad_w(params["w_neigh2"], hid_pad, h_out_pad)
    b2 = pad_b(params["b2"], h_out_pad)

    # conv1 + ReLU (h1 stays bf16 and feeds conv2 directly).
    h1 = _sage_layer(mask_p, inv_deg_p, x_p, w_self1, w_neigh1, b1,
                     tm=tm, l2_normalize=False)
    # conv2 + ReLU + row L2 normalize.
    h2 = _sage_layer(mask_p, inv_deg_p, h1, w_self2, w_neigh2, b2,
                     tm=tm, l2_normalize=True)
    return h2[:n, :h_feats].astype(jnp.float32)


def graphsage_reference(a_norm, x, params):
    """Pure-JAX f32 reference with the original module's semantics."""
    def layer(h, ws, wn, b):
        agg = a_norm @ h
        return jnp.maximum(h @ ws + agg @ wn + b, 0.0)
    h = layer(x, params["w_self1"], params["w_neigh1"], params["b1"])
    h = layer(h, params["w_self2"], params["w_neigh2"], params["b2"])
    norm = jnp.sqrt(jnp.sum(h * h, axis=1, keepdims=True))
    return h / jnp.maximum(norm, 1e-12)


def init_params(key, in_feats, hidden, h_feats):
    ks = jax.random.split(key, 4)
    s1 = 1.0 / jnp.sqrt(in_feats * 1.0)
    s2 = 1.0 / jnp.sqrt(hidden * 1.0)
    return {
        "w_self1":  jax.random.normal(ks[0], (in_feats, hidden), jnp.float32) * s1,
        "w_neigh1": jax.random.normal(ks[1], (in_feats, hidden), jnp.float32) * s1,
        "b1":       jnp.zeros((1, hidden), jnp.float32),
        "w_self2":  jax.random.normal(ks[2], (hidden, h_feats), jnp.float32) * s2,
        "w_neigh2": jax.random.normal(ks[3], (hidden, h_feats), jnp.float32) * s2,
        "b2":       jnp.zeros((1, h_feats), jnp.float32),
    }


if __name__ == "__main__":
    N = 16          # number of graph nodes
    IN_FEATS = 32   # input feature dim
    HIDDEN = 256    # fixed by the module (conv1 output width)
    H_FEATS = 16    # output feature dim

    key = jax.random.PRNGKey(0)
    k_x, k_adj, k_w = jax.random.split(key, 3)

    # Node features (N, F_in)
    x = jax.random.normal(k_x, (N, IN_FEATS), jnp.float32)

    # Deterministic random directed 0/1 adjacency (rows = destination nodes).
    adj = (jax.random.uniform(k_adj, (N, N)) < 0.3).astype(jnp.float32)
    adj = adj * (1.0 - jnp.eye(N, dtype=jnp.float32))   # no self loops

    params = init_params(k_w, IN_FEATS, HIDDEN, H_FEATS)

    # One-time graph preprocessing (outside the jitted per-call path).
    mask_p, inv_deg_p, tm, _ = prepare_graph(adj)

    fwd = jax.jit(functools.partial(graphsage_forward, n=N, tm=tm))
    out = fwd(mask_p, inv_deg_p, x, params)
    out = jax.block_until_ready(out)

    assert out.shape == (N, H_FEATS)
    assert bool(jnp.all(jnp.isfinite(out)))

    # f32 reference ('mean' aggregation is exact in-kernel; remaining error is
    # bf16 rounding of X / h1 / output on L2-normalized (<= 1) values).
    in_deg = jnp.maximum(jnp.sum(adj, axis=1, keepdims=True), 1.0)
    a_norm = adj / in_deg
    ref = graphsage_reference(a_norm, x, params)
    max_err = float(jnp.max(jnp.abs(out - ref)))
    assert max_err < 0.05, f"max abs error vs f32 reference too large: {max_err}"

    print("KERNEL_OK")
</pallas_src>

<mosaic_0001>
module attributes {stable_mosaic.version = 11 : i64} {
  func.func @sage_layer_kernel(%arg0: i32, %arg1: memref<16x16xbf16, #tpu.memory_space<vmem>>, %arg2: memref<16x1xf32, #tpu.memory_space<vmem>>, %arg3: memref<16x128xbf16, #tpu.memory_space<vmem>>, %arg4: memref<128x256xbf16, #tpu.memory_space<vmem>>, %arg5: memref<128x256xbf16, #tpu.memory_space<vmem>>, %arg6: memref<1x256xf32, #tpu.memory_space<vmem>>, %arg7: memref<16x256xbf16, #tpu.memory_space<vmem>>) attributes {dimension_semantics = [#tpu.dimension_semantics<parallel>], iteration_bounds = array<i64: 1>, scalar_prefetch = 0 : i64, scratch_operands = 0 : i64, tpu.core_type = #tpu.core_type<tc>, window_params = [{transform_indices = @transform_0, window_bounds = array<i64: 16, 16>}, {transform_indices = @transform_1, window_bounds = array<i64: 16, 1>}, {pipeline_mode = #tpu.pipeline_mode<synchronous>, transform_indices = @transform_2, window_bounds = array<i64: 16, 128>}, {pipeline_mode = #tpu.pipeline_mode<synchronous>, transform_indices = @transform_3, window_bounds = array<i64: 128, 256>}, {pipeline_mode = #tpu.pipeline_mode<synchronous>, transform_indices = @transform_4, window_bounds = array<i64: 128, 256>}, {pipeline_mode = #tpu.pipeline_mode<synchronous>, transform_indices = @transform_5, window_bounds = array<i64: 1, 256>}, {transform_indices = @transform_6, window_bounds = array<i64: 16, 256>}]} {
    %c16_i32 = arith.constant 16 : i32
    %0 = arith.muli %arg0, %c16_i32 : i32
    %1 = tpu.assume_multiple %0, 16 : i32
    %c0 = arith.constant 0 : index
    %c0_0 = arith.constant 0 : index
    %2 = vector.load %arg1[%c0, %c0_0] : memref<16x16xbf16, #tpu.memory_space<vmem>>, vector<16x16xbf16>
    %c0_1 = arith.constant 0 : index
    %c0_2 = arith.constant 0 : index
    %3 = vector.load %arg3[%c0_1, %c0_2] : memref<16x128xbf16, #tpu.memory_space<vmem>>, vector<16x128xbf16>
    %cst = arith.constant dense<0.000000e+00> : vector<16x128xf32>
    %4 = tpu.matmul %2, %3, %cst {dimension_numbers = #tpu.dot_dimension_numbers<[1], [0], [0], [1], [0, 0, 1, 1], [], []>} : vector<16x16xbf16>, vector<16x128xbf16>, vector<16x128xf32> -> vector<16x128xf32>
    %c0_3 = arith.constant 0 : index
    %c0_4 = arith.constant 0 : index
    %5 = vector.load %arg2[%c0_3, %c0_4] : memref<16x1xf32, #tpu.memory_space<vmem>>, vector<16x1xf32>
    %6 = vector.broadcast %5 : vector<16x1xf32> to vector<16x128xf32>
    %7 = arith.mulf %4, %6 : vector<16x128xf32>
    %8 = arith.index_cast %1 : i32 to index
    %c0_5 = arith.constant 0 : index
    %9 = vector.load %arg3[%8, %c0_5] : memref<16x128xbf16, #tpu.memory_space<vmem>>, vector<16x128xbf16>
    %c0_6 = arith.constant 0 : index
    %c0_7 = arith.constant 0 : index
    %10 = vector.load %arg4[%c0_6, %c0_7] : memref<128x256xbf16, #tpu.memory_space<vmem>>, vector<128x256xbf16>
    %cst_8 = arith.constant dense<0.000000e+00> : vector<16x256xf32>
    %11 = tpu.matmul %9, %10, %cst_8 {dimension_numbers = #tpu.dot_dimension_numbers<[1], [0], [0], [1], [0, 0, 1, 1], [], []>} : vector<16x128xbf16>, vector<128x256xbf16>, vector<16x256xf32> -> vector<16x256xf32>
    %12 = arith.truncf %7 : vector<16x128xf32> to vector<16x128xbf16>
    %c0_9 = arith.constant 0 : index
    %c0_10 = arith.constant 0 : index
    %13 = vector.load %arg5[%c0_9, %c0_10] : memref<128x256xbf16, #tpu.memory_space<vmem>>, vector<128x256xbf16>
    %cst_11 = arith.constant dense<0.000000e+00> : vector<16x256xf32>
    %14 = tpu.matmul %12, %13, %cst_11 {dimension_numbers = #tpu.dot_dimension_numbers<[1], [0], [0], [1], [0, 0, 1, 1], [], []>} : vector<16x128xbf16>, vector<128x256xbf16>, vector<16x256xf32> -> vector<16x256xf32>
    %15 = arith.addf %11, %14 : vector<16x256xf32>
    %c0_12 = arith.constant 0 : index
    %c0_13 = arith.constant 0 : index
    %16 = vector.load %arg6[%c0_12, %c0_13] : memref<1x256xf32, #tpu.memory_space<vmem>>, vector<1x256xf32>
    %17 = vector.broadcast %16 : vector<1x256xf32> to vector<16x256xf32>
    %18 = arith.addf %15, %17 : vector<16x256xf32>
    %cst_14 = arith.constant 0.000000e+00 : f32
    %19 = vector.broadcast %cst_14 : f32 to vector<16x256xf32>
    %20 = arith.maximumf %18, %19 : vector<16x256xf32>
    %21 = arith.truncf %20 : vector<16x256xf32> to vector<16x256xbf16>
    %c0_15 = arith.constant 0 : index
    %c0_16 = arith.constant 0 : index
    %22 = vector.load %arg7[%c0_15, %c0_16] : memref<16x256xbf16, #tpu.memory_space<vmem>>, vector<16x256xbf16>
    tpu.vector_store %arg7[%c0_15, %c0_16], %21 {strides = array<i32>} : memref<16x256xbf16, #tpu.memory_space<vmem>>, vector<16x256xbf16>,
    return
  }
  func.func @transform_0(%arg0: i32) -> (i32, i32) {
    %c0_i32 = arith.constant 0 : i32
    %c0_i32_0 = arith.constant 0 : i32
    return %arg0, %c0_i32 : i32, i32
  }
  func.func @transform_1(%arg0: i32) -> (i32, i32) {
    %c0_i32 = arith.constant 0 : i32
    %c0_i32_0 = arith.constant 0 : i32
    return %arg0, %c0_i32 : i32, i32
  }
  func.func @transform_2(%arg0: i32) -> (i32, i32) {
    %c0_i32 = arith.constant 0 : i32
    %c0_i32_0 = arith.constant 0 : i32
    %c0_i32_1 = arith.constant 0 : i32
    return %c0_i32, %c0_i32_0 : i32, i32
  }
  func.func @transform_3(%arg0: i32) -> (i32, i32) {
    %c0_i32 = arith.constant 0 : i32
    %c0_i32_0 = arith.constant 0 : i32
    %c0_i32_1 = arith.constant 0 : i32
    return %c0_i32, %c0_i32_0 : i32, i32
  }
  func.func @transform_4(%arg0: i32) -> (i32, i32) {
    %c0_i32 = arith.constant 0 : i32
    %c0_i32_0 = arith.constant 0 : i32
    %c0_i32_1 = arith.constant 0 : i32
    return %c0_i32, %c0_i32_0 : i32, i32
  }
  func.func @transform_5(%arg0: i32) -> (i32, i32) {
    %c0_i32 = arith.constant 0 : i32
    %c0_i32_0 = arith.constant 0 : i32
    %c0_i32_1 = arith.constant 0 : i32
    return %c0_i32, %c0_i32_0 : i32, i32
  }
  func.func @transform_6(%arg0: i32) -> (i32, i32) {
    %c0_i32 = arith.constant 0 : i32
    %c0_i32_0 = arith.constant 0 : i32
    return %arg0, %c0_i32 : i32, i32
  }
}

module attributes {stable_mosaic.version = 11 : i64} {
  func.func @sage_layer_kernel(%arg0: i32, %arg1: memref<16x16xbf16, #tpu.memory_space<vmem>>, %arg2: memref<16x1xf32, #tpu.memory_space<vmem>>, %arg3: memref<16x256xbf16, #tpu.memory_space<vmem>>, %arg4: memref<256x128xbf16, #tpu.memory_space<vmem>>, %arg5: memref<256x128xbf16, #tpu.memory_space<vmem>>, %arg6: memref<1x128xf32, #tpu.memory_space<vmem>>, %arg7: memref<16x128xbf16, #tpu.memory_space<vmem>>) attributes {dimension_semantics = [#tpu.dimension_semantics<parallel>], iteration_bounds = array<i64: 1>, scalar_prefetch = 0 : i64, scratch_operands = 0 : i64, tpu.core_type = #tpu.core_type<tc>, window_params = [{transform_indices = @transform_0, window_bounds = array<i64: 16, 16>}, {transform_indices = @transform_1, window_bounds = array<i64: 16, 1>}, {pipeline_mode = #tpu.pipeline_mode<synchronous>, transform_indices = @transform_2, window_bounds = array<i64: 16, 256>}, {pipeline_mode = #tpu.pipeline_mode<synchronous>, transform_indices = @transform_3, window_bounds = array<i64: 256, 128>}, {pipeline_mode = #tpu.pipeline_mode<synchronous>, transform_indices = @transform_4, window_bounds = array<i64: 256, 128>}, {pipeline_mode = #tpu.pipeline_mode<synchronous>, transform_indices = @transform_5, window_bounds = array<i64: 1, 128>}, {transform_indices = @transform_6, window_bounds = array<i64: 16, 128>}]} {
    %c16_i32 = arith.constant 16 : i32
    %0 = arith.muli %arg0, %c16_i32 : i32
    %1 = tpu.assume_multiple %0, 16 : i32
    %c0 = arith.constant 0 : index
    %c0_0 = arith.constant 0 : index
    %2 = vector.load %arg1[%c0, %c0_0] : memref<16x16xbf16, #tpu.memory_space<vmem>>, vector<16x16xbf16>
    %c0_1 = arith.constant 0 : index
    %c0_2 = arith.constant 0 : index
    %3 = vector.load %arg3[%c0_1, %c0_2] : memref<16x256xbf16, #tpu.memory_space<vmem>>, vector<16x256xbf16>
    %cst = arith.constant dense<0.000000e+00> : vector<16x256xf32>
    %4 = tpu.matmul %2, %3, %cst {dimension_numbers = #tpu.dot_dimension_numbers<[1], [0], [0], [1], [0, 0, 1, 1], [], []>} : vector<16x16xbf16>, vector<16x256xbf16>, vector<16x256xf32> -> vector<16x256xf32>
    %c0_3 = arith.constant 0 : index
    %c0_4 = arith.constant 0 : index
    %5 = vector.load %arg2[%c0_3, %c0_4] : memref<16x1xf32, #tpu.memory_space<vmem>>, vector<16x1xf32>
    %6 = vector.broadcast %5 : vector<16x1xf32> to vector<16x256xf32>
    %7 = arith.mulf %4, %6 : vector<16x256xf32>
    %8 = arith.index_cast %1 : i32 to index
    %c0_5 = arith.constant 0 : index
    %9 = vector.load %arg3[%8, %c0_5] : memref<16x256xbf16, #tpu.memory_space<vmem>>, vector<16x256xbf16>
    %c0_6 = arith.constant 0 : index
    %c0_7 = arith.constant 0 : index
    %10 = vector.load %arg4[%c0_6, %c0_7] : memref<256x128xbf16, #tpu.memory_space<vmem>>, vector<256x128xbf16>
    %cst_8 = arith.constant dense<0.000000e+00> : vector<16x128xf32>
    %11 = tpu.matmul %9, %10, %cst_8 {dimension_numbers = #tpu.dot_dimension_numbers<[1], [0], [0], [1], [0, 0, 1, 1], [], []>} : vector<16x256xbf16>, vector<256x128xbf16>, vector<16x128xf32> -> vector<16x128xf32>
    %12 = arith.truncf %7 : vector<16x256xf32> to vector<16x256xbf16>
    %c0_9 = arith.constant 0 : index
    %c0_10 = arith.constant 0 : index
    %13 = vector.load %arg5[%c0_9, %c0_10] : memref<256x128xbf16, #tpu.memory_space<vmem>>, vector<256x128xbf16>
    %cst_11 = arith.constant dense<0.000000e+00> : vector<16x128xf32>
    %14 = tpu.matmul %12, %13, %cst_11 {dimension_numbers = #tpu.dot_dimension_numbers<[1], [0], [0], [1], [0, 0, 1, 1], [], []>} : vector<16x256xbf16>, vector<256x128xbf16>, vector<16x128xf32> -> vector<16x128xf32>
    %15 = arith.addf %11, %14 : vector<16x128xf32>
    %c0_12 = arith.constant 0 : index
    %c0_13 = arith.constant 0 : index
    %16 = vector.load %arg6[%c0_12, %c0_13] : memref<1x128xf32, #tpu.memory_space<vmem>>, vector<1x128xf32>
    %17 = vector.broadcast %16 : vector<1x128xf32> to vector<16x128xf32>
    %18 = arith.addf %15, %17 : vector<16x128xf32>
    %cst_14 = arith.constant 0.000000e+00 : f32
    %19 = vector.broadcast %cst_14 : f32 to vector<16x128xf32>
    %20 = arith.maximumf %18, %19 : vector<16x128xf32>
    %21 = arith.mulf %20, %20 : vector<16x128xf32>
    %cst_15 = arith.constant dense<0.000000e+00> : vector<16xf32>
    %22 = vector.multi_reduction <add>, %21, %cst_15 [1] : vector<16x128xf32> to vector<16xf32>
    %23 = vector.shape_cast %22 : vector<16xf32> to vector<16x1xf32>
    %cst_16 = arith.constant 1.000000e-24 : f32
    %24 = vector.broadcast %cst_16 : f32 to vector<16x1xf32>
    %25 = arith.maximumf %23, %24 : vector<16x1xf32>
    %26 = math.rsqrt %25 : vector<16x1xf32>
    %27 = vector.broadcast %26 : vector<16x1xf32> to vector<16x128xf32>
    %28 = arith.mulf %20, %27 : vector<16x128xf32>
    %29 = arith.truncf %28 : vector<16x128xf32> to vector<16x128xbf16>
    %c0_17 = arith.constant 0 : index
    %c0_18 = arith.constant 0 : index
    %30 = vector.load %arg7[%c0_17, %c0_18] : memref<16x128xbf16, #tpu.memory_space<vmem>>, vector<16x128xbf16>
    tpu.vector_store %arg7[%c0_17, %c0_18], %29 {strides = array<i32>} : memref<16x128xbf16, #tpu.memory_space<vmem>>, vector<16x128xbf16>,
    return
  }
  func.func @transform_0(%arg0: i32) -> (i32, i32) {
    %c0_i32 = arith.constant 0 : i32
    %c0_i32_0 = arith.constant 0 : i32
    return %arg0, %c0_i32 : i32, i32
  }
  func.func @transform_1(%arg0: i32) -> (i32, i32) {
    %c0_i32 = arith.constant 0 : i32
    %c0_i32_0 = arith.constant 0 : i32
    return %arg0, %c0_i32 : i32, i32
  }
  func.func @transform_2(%arg0: i32) -> (i32, i32) {
    %c0_i32 = arith.constant 0 : i32
    %c0_i32_0 = arith.constant 0 : i32
    %c0_i32_1 = arith.constant 0 : i32
    return %c0_i32, %c0_i32_0 : i32, i32
  }
  func.func @transform_3(%arg0: i32) -> (i32, i32) {
    %c0_i32 = arith.constant 0 : i32
    %c0_i32_0 = arith.constant 0 : i32
    %c0_i32_1 = arith.constant 0 : i32
    return %c0_i32, %c0_i32_0 : i32, i32
  }
  func.func @transform_4(%arg0: i32) -> (i32, i32) {
    %c0_i32 = arith.constant 0 : i32
    %c0_i32_0 = arith.constant 0 : i32
    %c0_i32_1 = arith.constant 0 : i32
    return %c0_i32, %c0_i32_0 : i32, i32
  }
  func.func @transform_5(%arg0: i32) -> (i32, i32) {
    %c0_i32 = arith.constant 0 : i32
    %c0_i32_0 = arith.constant 0 : i32
    %c0_i32_1 = arith.constant 0 : i32
    return %c0_i32, %c0_i32_0 : i32, i32
  }
  func.func @transform_6(%arg0: i32) -> (i32, i32) {
    %c0_i32 = arith.constant 0 : i32
    %c0_i32_0 = arith.constant 0 : i32
    return %arg0, %c0_i32 : i32, i32
  }
}

</mosaic_0001>

<bundles_post_ra>
// kernel: graphsage_forward.2
= control target key start
LH: loop header
LB: loop body
LE: loop exit
PB: predicated region body
PF: predicated region fallthrough
CT: control target
= control target key end

     0   :  { %v537_v0 = vmov 0.0   ;;  %vm538_vm0 = vmmov 0   ;;  %v539_v3 = vmov 0   ;;  %vm40_vm1 = vcmask 130048   ;;  %s695_s2 = inlined_call_operand.vmem [shape: bf16[16,128], index: 2, kind: input, shape index: {}]   ;;  %s696_s0 = inlined_call_operand.vmem [shape: bf16[16,16], index: 0, kind: input, shape index: {}]   ;;  %s697_s1 = inlined_call_operand.vmem [shape: f32[16,1], index: 1, kind: input, shape index: {}]   ;;  %s698_s3 = inlined_call_operand.vmem [shape: bf16[128,256], index: 3, kind: input, shape index: {}]   ;;  %s699_s4 = inlined_call_operand.vmem [shape: bf16[128,256], index: 4, kind: input, shape index: {}]   ;;  %s700_s5 = inlined_call_operand.vmem [shape: f32[1,256], index: 5, kind: input, shape index: {}]   ;;  %s701_s6 = inlined_call_operand.vmem [shape: bf16[16,256], index: 6, kind: output, shape index: {}]  }
   0x1   :  { %472 = vmatprep.subr.bf16.mxu0 %v537_v0  ;;  %v486_v1 = vld [vmem:[%s695_s2] sm:$0xff]   ;;  %474 = vmatprep.mubr.msk.bf16.mxu0 %vm538_vm0, %v537_v0  ;;  %v86_v5 = vld [vmem:[%s697_s1 + $0x8] sm:$0xff]  ;;  %v494_v10 = vld [vmem:[%s698_s3 + $0x14] ss:$8 sps:$4 sm:$0xff]   ;;  %v392_v52 = vlaneseq }
   0x2   :  { %v487_v2 = vld [vmem:[%s696_s0] sm:$0xff]   ;;  %485 = vset.pattern.permute.xlu0 %v539_v3  ;;  %379 = vmatprep.mubr.bf16.mxu1 %v539_v3  ;;  %v496_v11 = vld [vmem:[%s698_s3 + $0x10] ss:$8 sps:$4 sm:$0xff]   ;;  %v499_v13 = vld [vmem:[%s699_s4 + $0x14] ss:$8 sps:$4 sm:$0xff]  }
   0x3   :  { %473 = vmatpush3.bf16.msra.mxu0 %v486_v1  ;;  %v85_v4 = vld [vmem:[%s697_s1] sm:$0xff]  ;;  %v497_v12 = vld [vmem:[%s699_s4 + $0x10] ss:$8 sps:$4 sm:$0xff]   ;;  %v506_v17 = vld [vmem:[%s698_s3 + $0x34] ss:$8 sps:$4 sm:$0xff]   ;;  %v393_v53 = vshrl.u32 %v392_v52, 7 }
   0x4   :  { %89 = vperm.xlu0 %485, %v85_v4   ;;  %v488_v6 = vld [vmem:[%s698_s3 + $0x4] ss:$8 sps:$4 sm:$0xff]   ;;  %v490_v7 = vld [vmem:[%s698_s3] ss:$8 sps:$4 sm:$0xff]   ;;  %v511_v19 = vld [vmem:[%s699_s4 + $0x34] ss:$8 sps:$4 sm:$0xff]  }
   0x5   :  { %v491_v8 = vld [vmem:[%s699_s4] ss:$8 sps:$4 sm:$0xff]   ;;  %347 = vmatprep.subr.bf16.mxu1 %v488_v6  ;;  %v493_v9 = vld [vmem:[%s699_s4 + $0x4] ss:$8 sps:$4 sm:$0xff]   ;;  %v508_v20 = vld [vmem:[%s698_s3 + $0x30] ss:$8 sps:$4 sm:$0xff]  }
   0x6   :  { %475 = vmatmul.mubr.msk.bf16.vlgmr.msra.gmra.mrb[0].mxu0 %vm40_vm1, %v487_v2  ;;  %348 = vmatpush1.bf16.msra.mxu1 %v490_v7  ;;  %v500_v14 = vld [vmem:[%s698_s3 + $0x24] ss:$8 sps:$4 sm:$0xff]   ;;  %v502_v15 = vld [vmem:[%s698_s3 + $0x20] ss:$8 sps:$4 sm:$0xff]   ;;  %v509_v22 = vld [vmem:[%s699_s4 + $0x30] ss:$8 sps:$4 sm:$0xff]  }
   0x7   :  { %250 = vmatprep.mubr.bf16.mxu0 %v539_v3  ;;  %218 = vmatprep.subr.bf16.mxu0 %v493_v9  ;;  %v505_v16 = vld [vmem:[%s699_s4 + $0x24] ss:$8 sps:$4 sm:$0xff]   ;;  %v503_v18 = vld [vmem:[%s699_s4 + $0x20] ss:$8 sps:$4 sm:$0xff]   ;;  %v518_v26 = vld [vmem:[%s698_s3 + $0x54] ss:$8 sps:$4 sm:$0xff]  }
   0x8   :  { %94 = vperm.xlu0 %485, %v86_v5   ;;  %219 = vmatpush1.bf16.msra.mxu0 %v491_v8  ;;  %v512_v21 = vld [vmem:[%s698_s3 + $0x44] ss:$8 sps:$4 sm:$0xff]   ;;  %v514_v24 = vld [vmem:[%s698_s3 + $0x40] ss:$8 sps:$4 sm:$0xff]   ;;  %v520_v27 = vld [vmem:[%s698_s3 + $0x50] ss:$8 sps:$4 sm:$0xff]  }
   0x9   :  { %349 = vmatprep.subr.bf16.mxu1 %v494_v10  ;;  %220 = vmatprep.subr.bf16.mxu0 %v499_v13  ;;  %v517_v23 = vld [vmem:[%s699_s4 + $0x44] ss:$8 sps:$4 sm:$0xff]   ;;  %v515_v25 = vld [vmem:[%s699_s4 + $0x40] ss:$8 sps:$4 sm:$0xff]   ;;  %v523_v28 = vld [vmem:[%s699_s4 + $0x54] ss:$8 sps:$4 sm:$0xff]  }
   0xa   :  { %350 = vmatpush1.bf16.msra.mxu1 %v496_v11  ;;  %v524_v29 = vld [vmem:[%s698_s3 + $0x64] ss:$8 sps:$4 sm:$0xff]   ;;  %v521_v30 = vld [vmem:[%s699_s4 + $0x50] ss:$8 sps:$4 sm:$0xff]   ;;  %v526_v32 = vld [vmem:[%s698_s3 + $0x60] ss:$8 sps:$4 sm:$0xff]  }
   0xb   :  { %351 = vmatprep.subr.bf16.mxu1 %v500_v14  ;;  %v529_v31 = vld [vmem:[%s699_s4 + $0x64] ss:$8 sps:$4 sm:$0xff]   ;;  %v527_v33 = vld [vmem:[%s699_s4 + $0x60] ss:$8 sps:$4 sm:$0xff]   ;;  %v530_v34 = vld [vmem:[%s698_s3 + $0x74] ss:$8 sps:$4 sm:$0xff]  }
   0xc   :  { %221 = vmatpush1.bf16.msra.mxu0 %v497_v12  ;;  %v532_v35 = vld [vmem:[%s698_s3 + $0x70] ss:$8 sps:$4 sm:$0xff]   ;;  %v535_v36 = vld [vmem:[%s699_s4 + $0x74] ss:$8 sps:$4 sm:$0xff]   ;;  %v536_v38 = vld [vmem:[%s695_s2] sm:$0xff]   ;;  %v394_v54 = vsub.s32 0, %v393_v53 }
   0xd   :  { %222 = vmatprep.subr.bf16.mxu0 %v505_v16  ;;  %v533_v37 = vld [vmem:[%s699_s4 + $0x70] ss:$8 sps:$4 sm:$0xff]   ;;  %v390_v55 = vld [vmem:[%s700_s5] sm:$0x3]  ;;  %v398_v56 = vsub.s32 1, %v393_v53 }
   0xe   :  { %352 = vmatpush1.bf16.msra.mxu1 %v502_v15  ;;  %v395_v57 = vrot.slane %v390_v55, %v394_v54 }
   0xf   :  { %353 = vmatprep.subr.bf16.mxu1 %v506_v17  ;;  %v399_v59 = vrot.slane %v390_v55, %v398_v56 }
  0x10   :  { %223 = vmatpush1.bf16.msra.mxu0 %v503_v18 }
  0x11   :  { %224 = vmatprep.subr.bf16.mxu0 %v511_v19 }
  0x12   :  { %354 = vmatpush1.bf16.msra.mxu1 %v508_v20 }
  0x13   :  { %355 = vmatprep.subr.bf16.mxu1 %v512_v21 }
  0x14   :  { %225 = vmatpush1.bf16.msra.mxu0 %v509_v22 }
  0x15   :  { %226 = vmatprep.subr.bf16.mxu0 %v517_v23 }
  0x16   :  { %356 = vmatpush1.bf16.msra.mxu1 %v514_v24 }
  0x17   :  { %357 = vmatprep.subr.bf16.mxu1 %v518_v26 }
  0x18   :  { %227 = vmatpush1.bf16.msra.mxu0 %v515_v25 }
  0x19   :  { %228 = vmatprep.subr.bf16.mxu0 %v523_v28 }
  0x1a   :  { %358 = vmatpush1.bf16.msra.mxu1 %v520_v27 }
  0x1b   :  { %359 = vmatprep.subr.bf16.mxu1 %v524_v29 }
  0x1c   :  { %229 = vmatpush1.bf16.msra.mxu0 %v521_v30 }
  0x1d   :  { %230 = vmatprep.subr.bf16.mxu0 %v529_v31 }
  0x1e   :  { %360 = vmatpush1.bf16.msra.mxu1 %v526_v32 }
  0x1f   :  { %361 = vmatprep.subr.bf16.mxu1 %v530_v34 }
  0x20   :  { %231 = vmatpush1.bf16.msra.mxu0 %v527_v33 }
  0x21   :  { %232 = vmatprep.subr.bf16.mxu0 %v535_v36 }
  0x22   :  { %362 = vmatpush1.bf16.msra.mxu1 %v532_v35 }
  0x24   :  { %233 = vmatpush1.bf16.msra.mxu0 %v533_v37 }
  0x25   :  { %380 = vmatmul.mubr.bf16.vlgmr.msra.gmra.mrb[0].mxu1 %v536_v38 }
  0x83   :  { %v90_v39 = vpop.permute.xlu0 %89 }
  0x87   :  { %v95_v42 = vpop.permute.xlu0 %94 }
  0xd9   :  { %v78_v40 = vpop.f32.mrb[0].mxu0 }
  0xda   :  { %v476_v41 = vpop.f32.mrb[1].mxu0  ;;  %v97_v44 = vmul.f32 %v90_v39, %v78_v40 }
  0xdb   :  { %v81_v43 = vpop.f32.mrb[2].mxu0 }
  0xdc   :  { %v98_v45 = vmul.f32 %v95_v42, %v81_v43  ;;  %v477_v46 = vpop.f32.mrb[3].mxu0 }
  0xde   :  { %v121_v47 = vpack.c.bf16 %v98_v45, %v97_v44 }
  0xe0   :  { %251 = vmatmul.mubr.bf16.vlgmr.msra.gmra.mrb[4].mxu0 %v121_v47 }
  0xf8   :  { %v381_v48 = vpop.f32.mrb[0].mxu1 }
  0xf9   :  { %v383_v49 = vpop.f32.mrb[1].mxu1 }
  0xfa   :  { %v385_v50 = vpop.f32.mrb[2].mxu1 }
  0xfb   :  { %v387_v51 = vpop.f32.mrb[3].mxu1 }
 0x1b3   :  { %v252_v58 = vpop.f32.mrb[4].mxu0 }
 0x1b4   :  { %v382_v60 = vadd.f32 %v381_v48, %v252_v58  ;;  %v254_v61 = vpop.f32.mrb[5].mxu0 }
 0x1b5   :  { %v384_v62 = vadd.f32 %v383_v49, %v254_v61  ;;  %v256_v63 = vpop.f32.mrb[6].mxu0 }
 0x1b6   :  { %v402_v0 = vadd.f32 %v395_v57, %v382_v60  ;;  %v386_v1 = vadd.f32 %v385_v50, %v256_v63  ;;  %v258_v2 = vpop.f32.mrb[7].mxu0 }
 0x1b7   :  { %v403_v3 = vadd.f32 %v399_v59, %v384_v62  ;;  %v388_v4 = vadd.f32 %v387_v51, %v258_v2 }
 0x1b8   :  { %v406_v5 = vmax.f32 %v402_v0, 0.0  ;;  %v404_v6 = vadd.f32 %v395_v57, %v386_v1 }
 0x1b9   :  { %v407_v7 = vmax.f32 %v403_v3, 0.0  ;;  %v405_v8 = vadd.f32 %v399_v59, %v388_v4 }
 0x1ba   :  { %v408_v9 = vmax.f32 %v404_v6, 0.0 }
 0x1bb   :  { %v468_v10 = vpack.c.bf16 %v407_v7, %v406_v5  ;;  %v409_v11 = vmax.f32 %v405_v8, 0.0 }
 0x1bd   :  { %422 = vst [vmem:[%s701_s6] sm:$0xff] %v468_v10  ;;  %v469_v12 = vpack.c.bf16 %v409_v11, %v408_v9 }
 0x1bf   :  { %423 = vst [vmem:[%s701_s6 + $0x8] sm:$0xff] %v469_v12 }

// kernel: graphsage_forward.3
= control target key start
LH: loop header
LB: loop body
LE: loop exit
PB: predicated region body
PF: predicated region fallthrough
CT: control target
= control target key end

     0   :  { %v637_v1 = vmov 0   ;;  %vm44_vm0 = vcmask 130048   ;;  %s794_s2 = inlined_call_operand.vmem [shape: bf16[16,256], index: 2, kind: input, shape index: {}]   ;;  %s795_s0 = inlined_call_operand.vmem [shape: bf16[16,16], index: 0, kind: input, shape index: {}]   ;;  %s796_s1 = inlined_call_operand.vmem [shape: f32[16,1], index: 1, kind: input, shape index: {}]   ;;  %s797_s3 = inlined_call_operand.vmem [shape: bf16[256,128], index: 3, kind: input, shape index: {}]   ;;  %s798_s4 = inlined_call_operand.vmem [shape: bf16[256,128], index: 4, kind: input, shape index: {}]   ;;  %s799_s5 = inlined_call_operand.vmem [shape: f32[1,128], index: 5, kind: input, shape index: {}]   ;;  %s800_s6 = inlined_call_operand.vmem [shape: bf16[16,128], index: 6, kind: output, shape index: {}]  }
   0x1   :  { %v597_v0 = vld [vmem:[%s794_s2 + $0x4] ss:$8 sps:$4 sm:$0xff]   ;;  %80 = vmatprep.mubr.bf16.mxu0 %v637_v1  ;;  %596 = vset.pattern.permute.xlu0 %v637_v1  ;;  %v679_v2 = vld [vmem:[%s794_s2] ss:$8 sps:$4 sm:$0xff]   ;;  %v609_v14 = vld [vmem:[%s797_s3 + $0x50] sm:$0xff]  }
   0x2   :  { %48 = vmatprep.subr.bf16.mxu0 %v597_v0  ;;  %v600_v3 = vld [vmem:[%s795_s0] sm:$0xff]   ;;  %v92_v5 = vld [vmem:[%s796_s1 + $0x8] sm:$0xff]  ;;  %v610_v15 = vld [vmem:[%s797_s3 + $0x10] sm:$0xff]  }
   0x3   :  { %v91_v4 = vld [vmem:[%s796_s1] sm:$0xff]  ;;  %49 = vmatpush1.bf16.msra.mxu0 %v679_v2  ;;  %v605_v10 = vld [vmem:[%s797_s3 + $0x48] sm:$0xff]   ;;  %v611_v16 = vld [vmem:[%s798_s4 + $0x50] sm:$0xff]  }
   0x4   :  { %95 = vperm.xlu0 %596, %v91_v4   ;;  %v601_v6 = vld [vmem:[%s797_s3 + $0x40] sm:$0xff]   ;;  %v606_v11 = vld [vmem:[%s797_s3 + $0x8] sm:$0xff]   ;;  %v612_v17 = vld [vmem:[%s798_s4 + $0x10] sm:$0xff]  }
   0x5   :  { %v602_v7 = vld [vmem:[%s797_s3] sm:$0xff]   ;;  %573 = vmatprep.subr.bf16.mxu0 %v601_v6  ;;  %v607_v12 = vld [vmem:[%s798_s4 + $0x48] sm:$0xff]   ;;  %v613_v18 = vld [vmem:[%s797_s3 + $0x58] sm:$0xff]  }
   0x6   :  { %v603_v8 = vld [vmem:[%s798_s4 + $0x40] sm:$0xff]   ;;  %506 = vmatmul.mubr.msk.bf16.vlgmr.msra.gmra.mrb[0].mxu0 %vm44_vm0, %v600_v3  ;;  %v608_v13 = vld [vmem:[%s798_s4 + $0x8] sm:$0xff]   ;;  %v614_v19 = vld [vmem:[%s797_s3 + $0x18] sm:$0xff]  }
   0x7   :  { %v604_v9 = vld [vmem:[%s798_s4] sm:$0xff]   ;;  %574 = vmatpush3.bf16.msra.mxu0 %v602_v7  ;;  %551 = vmatprep.subr.bf16.mxu1 %v603_v8  ;;  %v615_v20 = vld [vmem:[%s798_s4 + $0x58] sm:$0xff]   ;;  %v621_v26 = vld [vmem:[%s797_s3 + $0x68] sm:$0xff]  }
   0x8   :  { %100 = vperm.xlu0 %596, %v92_v5   ;;  %455 = vmatprep.mubr.bf16.mxu0 %v597_v0  ;;  %v616_v21 = vld [vmem:[%s798_s4 + $0x18] sm:$0xff]   ;;  %v617_v22 = vld [vmem:[%s797_s3 + $0x60] sm:$0xff]   ;;  %v622_v27 = vld [vmem:[%s797_s3 + $0x28] sm:$0xff]  }
   0x9   :  { %552 = vmatpush3.bf16.msra.mxu1 %v604_v9  ;;  %575 = vmatprep.subr.bf16.mxu0 %v605_v10  ;;  %v618_v23 = vld [vmem:[%s797_s3 + $0x20] sm:$0xff]   ;;  %v623_v28 = vld [vmem:[%s798_s4 + $0x68] sm:$0xff]   ;;  %v625_v30 = vld [vmem:[%s797_s3 + $0x70] sm:$0xff]  }
   0xa   :  { %553 = vmatprep.subr.bf16.mxu1 %v607_v12  ;;  %v619_v24 = vld [vmem:[%s798_s4 + $0x60] sm:$0xff]   ;;  %v624_v29 = vld [vmem:[%s798_s4 + $0x28] sm:$0xff]   ;;  %v626_v31 = vld [vmem:[%s797_s3 + $0x30] sm:$0xff]  }
   0xb   :  { %576 = vmatpush3.bf16.msra.mxu0 %v606_v11  ;;  %v620_v25 = vld [vmem:[%s798_s4 + $0x20] sm:$0xff]   ;;  %v627_v32 = vld [vmem:[%s798_s4 + $0x70] sm:$0xff]   ;;  %v629_v34 = vld [vmem:[%s797_s3 + $0x78] sm:$0xff]  }
   0xc   :  { %577 = vmatprep.subr.bf16.mxu0 %v609_v14  ;;  %v628_v33 = vld [vmem:[%s798_s4 + $0x30] sm:$0xff]   ;;  %v630_v35 = vld [vmem:[%s797_s3 + $0x38] sm:$0xff]   ;;  %v541_v61 = vld [vmem:[%s799_s5] ss:$0 sm:$0xff] }
   0xd   :  { %554 = vmatpush3.bf16.msra.mxu1 %v608_v13  ;;  %v631_v36 = vld [vmem:[%s798_s4 + $0x78] sm:$0xff]  }
   0xe   :  { %555 = vmatprep.subr.bf16.mxu1 %v611_v16  ;;  %v632_v37 = vld [vmem:[%s798_s4 + $0x38] sm:$0xff]  }
   0xf   :  { %578 = vmatpush3.bf16.msra.mxu0 %v610_v15 }
  0x10   :  { %579 = vmatprep.subr.bf16.mxu0 %v613_v18 }
  0x11   :  { %556 = vmatpush3.bf16.msra.mxu1 %v612_v17 }
  0x12   :  { %557 = vmatprep.subr.bf16.mxu1 %v615_v20 }
  0x13   :  { %580 = vmatpush3.bf16.msra.mxu0 %v614_v19 }
  0x14   :  { %581 = vmatprep.subr.bf16.mxu0 %v617_v22 }
  0x15   :  { %558 = vmatpush3.bf16.msra.mxu1 %v616_v21 }
  0x16   :  { %559 = vmatprep.subr.bf16.mxu1 %v619_v24 }
  0x17   :  { %582 = vmatpush3.bf16.msra.mxu0 %v618_v23 }
  0x18   :  { %583 = vmatprep.subr.bf16.mxu0 %v621_v26 }
  0x19   :  { %560 = vmatpush3.bf16.msra.mxu1 %v620_v25 }
  0x1a   :  { %561 = vmatprep.subr.bf16.mxu1 %v623_v28 }
  0x1b   :  { %584 = vmatpush3.bf16.msra.mxu0 %v622_v27 }
  0x1c   :  { %585 = vmatprep.subr.bf16.mxu0 %v625_v30 }
  0x1d   :  { %562 = vmatpush3.bf16.msra.mxu1 %v624_v29 }
  0x1e   :  { %563 = vmatprep.subr.bf16.mxu1 %v627_v32 }
  0x1f   :  { %586 = vmatpush3.bf16.msra.mxu0 %v626_v31 }
  0x20   :  { %587 = vmatprep.subr.bf16.mxu0 %v629_v34 }
  0x21   :  { %564 = vmatpush3.bf16.msra.mxu1 %v628_v33 }
  0x22   :  { %565 = vmatprep.subr.bf16.mxu1 %v631_v36 }
  0x23   :  { %588 = vmatpush3.bf16.msra.mxu0 %v630_v35 }
  0x25   :  { %566 = vmatpush3.bf16.msra.mxu1 %v632_v37 }
  0x26   :  { %456 = vmatmul.mubr.bf16.vlgmr.msra.gmra.mrb[4].mxu0 %v679_v2 }
  0x83   :  { %v96_v38 = vpop.permute.xlu0 %95 }
  0x87   :  { %v101_v41 = vpop.permute.xlu0 %100 }
  0xd9   :  { %v82_v39 = vpop.f32.mrb[0].mxu0 }
  0xda   :  { %v84_v40 = vpop.f32.mrb[1].mxu0  ;;  %v103_v43 = vmul.f32 %v96_v38, %v82_v39 }
  0xdb   :  { %v86_v42 = vpop.f32.mrb[2].mxu0  ;;  %v104_v46 = vmul.f32 %v96_v38, %v84_v40 }
  0xdc   :  { %v105_v44 = vmul.f32 %v101_v41, %v86_v42  ;;  %v88_v45 = vpop.f32.mrb[3].mxu0 }
  0xdd   :  { %v106_v47 = vmul.f32 %v101_v41, %v88_v45 }
  0xde   :  { %v146_v48 = vpack.c.bf16 %v105_v44, %v103_v43 }
  0xdf   :  { %v147_v49 = vpack.c.bf16 %v106_v47, %v104_v46 }
  0xe1   :  { %308 = vmatprep.mubr.bf16.mxu1 %v147_v49 }
  0xe2   :  { %309 = vmatmul.mubr.bf16.vlgmr.msra.gmra.mrb[0].mxu1 %v146_v48 }
  0xf9   :  { %v589_v50 = vpop.f32.mrb[4].mxu0 }
  0xfa   :  { %v590_v51 = vpop.f32.mrb[5].mxu0 }
  0xfb   :  { %v591_v52 = vadd.f32 %v590_v51, %v589_v50  ;;  %v592_v53 = vpop.f32.mrb[6].mxu0 }
  0xfc   :  { %v593_v54 = vpop.f32.mrb[7].mxu0 }
  0xfd   :  { %v594_v55 = vadd.f32 %v593_v54, %v592_v53 }
 0x1b5   :  { %v567_v56 = vpop.f32.mrb[0].mxu1 }
 0x1b6   :  { %v568_v57 = vpop.f32.mrb[1].mxu1 }
 0x1b7   :  { %v569_v58 = vadd.f32 %v568_v57, %v567_v56  ;;  %v570_v59 = vpop.f32.mrb[2].mxu1 }
 0x1b8   :  { %v571_v60 = vpop.f32.mrb[3].mxu1 }
 0x1b9   :  { %v458_v62 = vadd.f32 %v591_v52, %v569_v58  ;;  %v572_v63 = vadd.f32 %v571_v60, %v570_v59 }
 0x1bb   :  { %v461_v0 = vadd.f32 %v594_v55, %v572_v63  ;;  %v471_v1 = vadd.f32 %v541_v61, %v458_v62 }
 0x1bd   :  { %v473_v2 = vmax.f32 %v471_v1, 0.0  ;;  %v472_v3 = vadd.f32 %v541_v61, %v461_v0 }
 0x1bf   :  { %v475_v4 = vmul.f32 %v473_v2, %v473_v2  ;;  %v474_v5 = vmax.f32 %v472_v3, 0.0 }
 0x1c1   :  { %477 = vadd.xlane.f32.xlu1 %v475_v4  ;;  %v476_v6 = vmul.f32 %v474_v5, %v474_v5 }
 0x1c5   :  { %479 = vadd.xlane.f32.xlu1 %v476_v6 }
 0x24e   :  { %v478_v7 = vpop.xlane.xlu1 %477 }
 0x24f   :  { %v481_v8 = vmax.f32 %v478_v7, 1e-24 }
 0x251   :  { %633 = vrsqrt.f32 %v481_v8 }
 0x252   :  { %v480_v9 = vpop.xlane.xlu1 %479 }
 0x253   :  { %v482_v10 = vmax.f32 %v480_v9, 1e-24 }
 0x255   :  { %635 = vrsqrt.f32 %v482_v10 }
 0x25b   :  { %v634_v11 = vpop.eup %633 }
 0x25c   :  { %v485_v13 = vmul.f32 %v634_v11, %v473_v2 }
 0x25f   :  { %v636_v12 = vpop.eup %635 }
 0x260   :  { %v486_v14 = vmul.f32 %v636_v12, %v474_v5 }
 0x262   :  { %v549_v15 = vpack.c.bf16 %v486_v14, %v485_v13 }
 0x264   :  { %550 = vst [vmem:[%s800_s6] sm:$0xff] %v549_v15  }

</bundles_post_ra>
